<compile_context>
chip_gen: v7x
topology: tpu7x:2x2x1
jax: 0.10.0
libtpu: 0.0.40
codegen_flags: <defaults>
</compile_context>

<pallas_src>
import functools

import jax
import jax.numpy as jnp
import numpy as np
from jax.experimental import pallas as pl
from jax.experimental.pallas import tpu as pltpu

# ---- module hyper-parameters (Conv1d(cin,cout,1), Conv1d(cout,cout,k,s,g,pad=4), Conv1d(cout,cout,1)) ----
CIN, COUT, K, S, G = 4, 8, 3, 1, 8   # g == cout -> depthwise
PAD = 4
BN_EPS = 1e-5

# column layout of the packed (COUT, NPARAM_COLS) parameter matrix
_W1 = 0                      # cols [0, CIN)            : w1[:, c]   (folded BN1 scale)
_B1 = CIN                    # col  CIN                 : b1         (folded BN1 bias)
_WDW = CIN + 1               # cols [CIN+1, CIN+1+K)    : wdw[:, j]  (folded BN2 scale)
_BDW = CIN + 1 + K           # col                      : bdw        (folded BN2 bias)
_W3 = CIN + K + 2            # cols [..., ...+COUT)     : w3[:, c]   (folded BN3 scale)
_B3 = CIN + K + 2 + COUT     # col                      : b3         (folded BN3 bias)
NPARAM_COLS = CIN + K + COUT + 3     # = 18


# ------------------------------- hardware queries --------------------------------
def _device_kind():
    try:
        return jax.devices()[0].device_kind.lower()
    except Exception:
        return ""


def _vmem_capacity_bytes():
    try:
        return int(pltpu.get_tpu_info().vmem_capacity_bytes)
    except Exception:
        # v7x has 64 MiB per TensorCore; older generations have 128 MiB.
        return (64 << 20) if "7" in _device_kind() else (128 << 20)


def _default_compute_dtype():
    k = _device_kind()
    # v5e and older have no bf16 VPU/EUP -> keep interior math in f32 there.
    if any(t in k for t in ("v2", "v3", "v4", "v5")):
        return jnp.float32
    return jnp.bfloat16


# ----------------------------------- kernel --------------------------------------
def _dwblock_kernel(x_ref, p_ref, o_ref, *, compute_dtype):
    """Fused block: bn batch elements, channels on sublanes, L on lanes.

    x_ref : (bn, CIN, L)        input block
    p_ref : (COUT, 18)          packed folded weights/biases (one column per tap/bias)
    o_ref : (bn, COUT, LOP)     output block, LOP = round_up(LO, 128) (lane-dense store)
    """
    bn, _, L = x_ref.shape
    LOP = o_ref.shape[2]
    cdt = compute_dtype

    pmat = p_ref[...].astype(cdt)                       # (COUT, 18) — one vreg

    def pcol(c):
        # (1, COUT, 1): one scalar per output channel, broadcast along batch & lanes
        return pmat[:, c:c + 1][None]

    x = x_ref[...].astype(cdt)                          # (bn, CIN, L)

    # ---- pointwise conv 1 (+ folded BN1) + ReLU -> (bn, COUT, L) : VPU broadcast-FMA
    h1 = pcol(_B1) + pcol(_W1) * x[:, 0:1, :]
    for c in range(1, CIN):
        h1 = h1 + pcol(_W1 + c) * x[:, c:c + 1, :]
    h1 = jnp.maximum(h1, 0.0)

    # ---- depthwise conv (groups == COUT, padding=PAD, stride=S) (+ folded BN2) + ReLU
    # zero-padded h1 built in registers (no VMEM scratch round-trip); the slab is
    # extended on the right so that all LOP output columns have valid taps (the
    # columns beyond the true LO are junk-but-finite and get sliced off outside).
    hpw = (LOP - 1) * S + K
    rpad = hpw - PAD - L
    hp = jnp.concatenate(
        [jnp.zeros((bn, COUT, PAD), cdt), h1, jnp.zeros((bn, COUT, rpad), cdt)],
        axis=-1)                                        # (bn, COUT, hpw)

    def tap(j):                                         # lane-shifted (strided) view of hp
        return jax.lax.slice(hp, (0, 0, j), (bn, COUT, j + (LOP - 1) * S + 1), (1, 1, S))

    acc = pcol(_BDW) + pcol(_WDW) * tap(0)              # bias folded into the init
    for j in range(1, K):
        acc = acc + pcol(_WDW + j) * tap(j)
    h2 = jnp.maximum(acc, 0.0)                          # (bn, COUT, LOP)

    # ---- pointwise conv 2 (+ folded BN3) + ReLU -> (bn, COUT, LOP) : VPU broadcast-FMA
    h3 = pcol(_B3) + pcol(_W3) * h2[:, 0:1, :]
    for c in range(1, COUT):
        h3 = h3 + pcol(_W3 + c) * h2[:, c:c + 1, :]
    h3 = jnp.maximum(h3, 0.0)

    o_ref[...] = h3.astype(o_ref.dtype)


# ---------------------------------- wrapper ---------------------------------------
def depthwise_conv1d_forward(x_ncl, packed_params, *, batch_block=None, compute_dtype=None):
    """x_ncl: (N, CIN, L) channels-first (same as the PyTorch module). Returns (N, COUT, LO)."""
    assert G == COUT, "kernel implements the depthwise case (groups == cout)"
    N, cin, L = x_ncl.shape
    assert cin == CIN
    LO = (L + 2 * PAD - K) // S + 1
    LOP = pl.cdiv(LO, 128) * 128            # lane-dense output width (multiple of 128)
    HPW = (LOP - 1) * S + K                 # width of the in-register padded-h1 slab
    assert HPW >= PAD + L

    if compute_dtype is None:
        compute_dtype = _default_compute_dtype()

    in_b = jnp.dtype(x_ncl.dtype).itemsize
    cd_b = jnp.dtype(compute_dtype).itemsize

    # Generation-aware VMEM budget.  128 MiB physical on v5e/v6e, 64 MiB on v7x.
    vmem_cap = _vmem_capacity_bytes()
    vmem_limit = int(min(vmem_cap * 3 // 4, 112 << 20))
    budget = vmem_limit // 2                # headroom for Mosaic temporaries / regalloc

    # Per-example footprint: double-buffered in/out blocks + live compute intermediates.
    per_ex = 2 * (CIN * L + COUT * LOP) * in_b + 6 * COUT * HPW * cd_b

    if batch_block is None:
        bn = max(1, min(N, budget // max(per_ex, 1)))   # biggest block that fits
        # Only 2-TensorCore chips (v7x) benefit from >= 2 "parallel" grid steps;
        # also keep n_blocks even there so the two cores get balanced work.
        if "7" in _device_kind() and N > 1:
            nb = pl.cdiv(N, bn)
            nb = (nb + (nb % 2)) if nb > 1 else 2
            bn = pl.cdiv(N, nb)
    else:
        bn = max(1, batch_block)

    n_blocks = pl.cdiv(N, bn)
    n_pad = n_blocks * bn
    if n_pad != N:
        x_ncl = jnp.pad(x_ncl, ((0, n_pad - N), (0, 0), (0, 0)))

    cost = pl.CostEstimate(
        flops=2 * N * LO * COUT * (CIN + K + COUT),
        transcendentals=0,
        bytes_accessed=N * (CIN * L + COUT * LO) * in_b + COUT * NPARAM_COLS * 4,
    )

    out = pl.pallas_call(
        functools.partial(_dwblock_kernel, compute_dtype=compute_dtype),
        out_shape=jax.ShapeDtypeStruct((n_pad, COUT, LOP), x_ncl.dtype),
        grid_spec=pltpu.PrefetchScalarGridSpec(
            num_scalar_prefetch=0,
            grid=(n_blocks,),
            in_specs=[
                pl.BlockSpec((bn, CIN, L), lambda n: (n, 0, 0)),          # x block
                pl.BlockSpec((COUT, NPARAM_COLS), lambda n: (0, 0)),      # packed params
            ],
            out_specs=pl.BlockSpec((bn, COUT, LOP), lambda n: (n, 0, 0)),
        ),
        compiler_params=pltpu.CompilerParams(
            dimension_semantics=("parallel",),
            vmem_limit_bytes=vmem_limit,
        ),
        cost_estimate=cost,
    )(x_ncl, packed_params)

    if n_pad != N:
        out = out[:N]
    if LOP != LO:
        out = out[:, :, :LO]
    return out


# ---------------------------- parameter setup (glue) ----------------------------
def init_raw_params(key):
    keys = iter(jax.random.split(key, 32))

    def nrm(shape, s=0.1):
        return s * jax.random.normal(next(keys), shape, jnp.float32)

    p = {}
    p["w1"] = nrm((COUT, CIN), 0.3)
    p["b1"] = nrm((COUT,))
    p["g1"] = 1.0 + nrm((COUT,)); p["be1"] = nrm((COUT,))
    p["m1"] = nrm((COUT,)); p["v1"] = 0.5 + jnp.abs(nrm((COUT,)))
    p["wdw"] = nrm((COUT, K), 0.3)          # torch shape (COUT, 1, K), squeezed
    p["bdw"] = nrm((COUT,))
    p["g2"] = 1.0 + nrm((COUT,)); p["be2"] = nrm((COUT,))
    p["m2"] = nrm((COUT,)); p["v2"] = 0.5 + jnp.abs(nrm((COUT,)))
    p["w3"] = nrm((COUT, COUT), 0.3)
    p["b3"] = nrm((COUT,))
    p["g3"] = 1.0 + nrm((COUT,)); p["be3"] = nrm((COUT,))
    p["m3"] = nrm((COUT,)); p["v3"] = 0.5 + jnp.abs(nrm((COUT,)))
    return p


def fold_and_pack_params(p):
    """Fold eval-mode BN into conv weights/biases and pack into one (COUT, 18) array."""
    s1 = p["g1"] / jnp.sqrt(p["v1"] + BN_EPS)
    w1 = p["w1"] * s1[:, None]                              # (COUT, CIN)
    b1 = s1 * (p["b1"] - p["m1"]) + p["be1"]                # (COUT,)
    s2 = p["g2"] / jnp.sqrt(p["v2"] + BN_EPS)
    wdw = p["wdw"] * s2[:, None]                            # (COUT, K)
    bdw = s2 * (p["bdw"] - p["m2"]) + p["be2"]
    s3 = p["g3"] / jnp.sqrt(p["v3"] + BN_EPS)
    w3 = p["w3"] * s3[:, None]                              # (COUT, COUT), col c = in-channel c
    b3 = s3 * (p["b3"] - p["m3"]) + p["be3"]
    packed = jnp.concatenate(
        [w1, b1[:, None], wdw, bdw[:, None], w3, b3[:, None]], axis=1)
    assert packed.shape == (COUT, NPARAM_COLS)
    return packed.astype(jnp.float32)


# ------------------------- pure-JAX reference (eval-mode BN) ---------------------
def ref_forward(x, p):
    def bn(y, g, b, m, v):
        return g[None, :, None] * (y - m[None, :, None]) / jnp.sqrt(v[None, :, None] + BN_EPS) + b[None, :, None]

    h = jnp.einsum("oc,ncl->nol", p["w1"], x) + p["b1"][None, :, None]
    h = jax.nn.relu(bn(h, p["g1"], p["be1"], p["m1"], p["v1"]))
    hp = jnp.pad(h, ((0, 0), (0, 0), (PAD, PAD)))
    LO = (h.shape[-1] + 2 * PAD - K) // S + 1
    acc = jnp.zeros((h.shape[0], COUT, LO), jnp.float32)
    for j in range(K):
        acc = acc + p["wdw"][:, j][None, :, None] * hp[:, :, j: j + (LO - 1) * S + 1: S]
    h2 = jax.nn.relu(bn(acc + p["bdw"][None, :, None], p["g2"], p["be2"], p["m2"], p["v2"]))
    h3 = jnp.einsum("oc,ncl->nol", p["w3"], h2) + p["b3"][None, :, None]
    return jax.nn.relu(bn(h3, p["g3"], p["be3"], p["m3"], p["v3"]))


if __name__ == "__main__":
    key = jax.random.PRNGKey(0)
    kx, kx2, kp = jax.random.split(key, 3)

    raw = init_raw_params(kp)
    packed = fold_and_pack_params(raw)

    # --- case 1: small demo shapes, f32 interior math -> tight check ---
    N, L = 2, 16
    x = jax.random.normal(kx, (N, CIN, L), jnp.float32)              # PyTorch NCL input
    out = jax.block_until_ready(
        depthwise_conv1d_forward(x, packed, compute_dtype=jnp.float32))
    ref = ref_forward(x, raw)
    np.testing.assert_allclose(np.asarray(out), np.asarray(ref), atol=1e-4, rtol=1e-4)

    # --- case 2: exercises batch padding (N not multiple of batch_block) + LOP slice ---
    N2, L2 = 5, 40
    x2 = jax.random.normal(kx2, (N2, CIN, L2), jnp.float32)
    out2 = jax.block_until_ready(
        depthwise_conv1d_forward(x2, packed, batch_block=2, compute_dtype=jnp.float32))
    ref2 = ref_forward(x2, raw)
    np.testing.assert_allclose(np.asarray(out2), np.asarray(ref2), atol=1e-4, rtol=1e-4)

    # --- case 3: bf16 interior math (perf path on v6e/v7x); looser tolerance ---
    if _default_compute_dtype() == jnp.bfloat16:
        out_bf = jax.block_until_ready(
            depthwise_conv1d_forward(x, packed, compute_dtype=jnp.bfloat16))
        np.testing.assert_allclose(np.asarray(out_bf), np.asarray(ref), atol=6e-2, rtol=6e-2)

    print("KERNEL_OK")
</pallas_src>

<mosaic_0001>
module attributes {stable_mosaic.version = 11 : i64} {
  func.func @_dwblock_kernel(%arg0: i32, %arg1: memref<2x4x16xf32, #tpu.memory_space<vmem>>, %arg2: memref<8x18xf32, #tpu.memory_space<vmem>>, %arg3: memref<2x8x128xf32, #tpu.memory_space<vmem>>) attributes {dimension_semantics = [#tpu.dimension_semantics<parallel>], iteration_bounds = array<i64: 1>, scalar_prefetch = 0 : i64, scratch_operands = 0 : i64, tpu.core_type = #tpu.core_type<tc>, window_params = [{transform_indices = @transform_0, window_bounds = array<i64: 2, 4, 16>}, {pipeline_mode = #tpu.pipeline_mode<synchronous>, transform_indices = @transform_1, window_bounds = array<i64: 8, 18>}, {transform_indices = @transform_2, window_bounds = array<i64: 2, 8, 128>}]} {
    %c0 = arith.constant 0 : index
    %c0_0 = arith.constant 0 : index
    %0 = vector.load %arg2[%c0, %c0_0] : memref<8x18xf32, #tpu.memory_space<vmem>>, vector<8x18xf32>
    %c0_1 = arith.constant 0 : index
    %c0_2 = arith.constant 0 : index
    %c0_3 = arith.constant 0 : index
    %1 = vector.load %arg1[%c0_1, %c0_2, %c0_3] : memref<2x4x16xf32, #tpu.memory_space<vmem>>, vector<2x4x16xf32>
    %2 = vector.extract_strided_slice %0 {offsets = [0, 4], sizes = [8, 1], strides = [1, 1]} : vector<8x18xf32> to vector<8x1xf32>
    %3 = vector.shape_cast %2 : vector<8x1xf32> to vector<1x8x1xf32>
    %4 = vector.extract_strided_slice %0 {offsets = [0, 0], sizes = [8, 1], strides = [1, 1]} : vector<8x18xf32> to vector<8x1xf32>
    %5 = vector.shape_cast %4 : vector<8x1xf32> to vector<1x8x1xf32>
    %6 = vector.extract_strided_slice %1 {offsets = [0, 0, 0], sizes = [2, 1, 16], strides = [1, 1, 1]} : vector<2x4x16xf32> to vector<2x1x16xf32>
    %7 = vector.broadcast %5 : vector<1x8x1xf32> to vector<2x8x16xf32>
    %8 = vector.broadcast %6 : vector<2x1x16xf32> to vector<2x8x16xf32>
    %9 = arith.mulf %7, %8 : vector<2x8x16xf32>
    %10 = vector.broadcast %3 : vector<1x8x1xf32> to vector<2x8x16xf32>
    %11 = arith.addf %10, %9 : vector<2x8x16xf32>
    %12 = vector.extract_strided_slice %0 {offsets = [0, 1], sizes = [8, 1], strides = [1, 1]} : vector<8x18xf32> to vector<8x1xf32>
    %13 = vector.shape_cast %12 : vector<8x1xf32> to vector<1x8x1xf32>
    %14 = vector.extract_strided_slice %1 {offsets = [0, 1, 0], sizes = [2, 1, 16], strides = [1, 1, 1]} : vector<2x4x16xf32> to vector<2x1x16xf32>
    %15 = vector.broadcast %13 : vector<1x8x1xf32> to vector<2x8x16xf32>
    %16 = vector.broadcast %14 : vector<2x1x16xf32> to vector<2x8x16xf32>
    %17 = arith.mulf %15, %16 : vector<2x8x16xf32>
    %18 = arith.addf %11, %17 : vector<2x8x16xf32>
    %19 = vector.extract_strided_slice %0 {offsets = [0, 2], sizes = [8, 1], strides = [1, 1]} : vector<8x18xf32> to vector<8x1xf32>
    %20 = vector.shape_cast %19 : vector<8x1xf32> to vector<1x8x1xf32>
    %21 = vector.extract_strided_slice %1 {offsets = [0, 2, 0], sizes = [2, 1, 16], strides = [1, 1, 1]} : vector<2x4x16xf32> to vector<2x1x16xf32>
    %22 = vector.broadcast %20 : vector<1x8x1xf32> to vector<2x8x16xf32>
    %23 = vector.broadcast %21 : vector<2x1x16xf32> to vector<2x8x16xf32>
    %24 = arith.mulf %22, %23 : vector<2x8x16xf32>
    %25 = arith.addf %18, %24 : vector<2x8x16xf32>
    %26 = vector.extract_strided_slice %0 {offsets = [0, 3], sizes = [8, 1], strides = [1, 1]} : vector<8x18xf32> to vector<8x1xf32>
    %27 = vector.shape_cast %26 : vector<8x1xf32> to vector<1x8x1xf32>
    %28 = vector.extract_strided_slice %1 {offsets = [0, 3, 0], sizes = [2, 1, 16], strides = [1, 1, 1]} : vector<2x4x16xf32> to vector<2x1x16xf32>
    %29 = vector.broadcast %27 : vector<1x8x1xf32> to vector<2x8x16xf32>
    %30 = vector.broadcast %28 : vector<2x1x16xf32> to vector<2x8x16xf32>
    %31 = arith.mulf %29, %30 : vector<2x8x16xf32>
    %32 = arith.addf %25, %31 : vector<2x8x16xf32>
    %cst = arith.constant 0.000000e+00 : f32
    %33 = vector.broadcast %cst : f32 to vector<2x8x16xf32>
    %34 = arith.maximumf %32, %33 : vector<2x8x16xf32>
    %cst_4 = arith.constant 0.000000e+00 : f32
    %35 = vector.broadcast %cst_4 : f32 to vector<2x8x4xf32>
    %cst_5 = arith.constant 0.000000e+00 : f32
    %36 = vector.broadcast %cst_5 : f32 to vector<2x8x110xf32>
    %37 = tpu.concatenate %35, %34, %36 in 2 : vector<2x8x4xf32>, vector<2x8x16xf32>, vector<2x8x110xf32> -> vector<2x8x130xf32>
    %38 = vector.extract_strided_slice %0 {offsets = [0, 8], sizes = [8, 1], strides = [1, 1]} : vector<8x18xf32> to vector<8x1xf32>
    %39 = vector.shape_cast %38 : vector<8x1xf32> to vector<1x8x1xf32>
    %40 = vector.extract_strided_slice %0 {offsets = [0, 5], sizes = [8, 1], strides = [1, 1]} : vector<8x18xf32> to vector<8x1xf32>
    %41 = vector.shape_cast %40 : vector<8x1xf32> to vector<1x8x1xf32>
    %42 = vector.extract_strided_slice %37 {offsets = [0, 0, 0], sizes = [2, 8, 128], strides = [1, 1, 1]} : vector<2x8x130xf32> to vector<2x8x128xf32>
    %43 = vector.broadcast %41 : vector<1x8x1xf32> to vector<2x8x128xf32>
    %44 = arith.mulf %43, %42 : vector<2x8x128xf32>
    %45 = vector.broadcast %39 : vector<1x8x1xf32> to vector<2x8x128xf32>
    %46 = arith.addf %45, %44 : vector<2x8x128xf32>
    %47 = vector.extract_strided_slice %0 {offsets = [0, 6], sizes = [8, 1], strides = [1, 1]} : vector<8x18xf32> to vector<8x1xf32>
    %48 = vector.shape_cast %47 : vector<8x1xf32> to vector<1x8x1xf32>
    %49 = vector.extract_strided_slice %37 {offsets = [0, 0, 1], sizes = [2, 8, 128], strides = [1, 1, 1]} : vector<2x8x130xf32> to vector<2x8x128xf32>
    %50 = vector.broadcast %48 : vector<1x8x1xf32> to vector<2x8x128xf32>
    %51 = arith.mulf %50, %49 : vector<2x8x128xf32>
    %52 = arith.addf %46, %51 : vector<2x8x128xf32>
    %53 = vector.extract_strided_slice %0 {offsets = [0, 7], sizes = [8, 1], strides = [1, 1]} : vector<8x18xf32> to vector<8x1xf32>
    %54 = vector.shape_cast %53 : vector<8x1xf32> to vector<1x8x1xf32>
    %55 = vector.extract_strided_slice %37 {offsets = [0, 0, 2], sizes = [2, 8, 128], strides = [1, 1, 1]} : vector<2x8x130xf32> to vector<2x8x128xf32>
    %56 = vector.broadcast %54 : vector<1x8x1xf32> to vector<2x8x128xf32>
    %57 = arith.mulf %56, %55 : vector<2x8x128xf32>
    %58 = arith.addf %52, %57 : vector<2x8x128xf32>
    %cst_6 = arith.constant 0.000000e+00 : f32
    %59 = vector.broadcast %cst_6 : f32 to vector<2x8x128xf32>
    %60 = arith.maximumf %58, %59 : vector<2x8x128xf32>
    %61 = vector.extract_strided_slice %0 {offsets = [0, 17], sizes = [8, 1], strides = [1, 1]} : vector<8x18xf32> to vector<8x1xf32>
    %62 = vector.shape_cast %61 : vector<8x1xf32> to vector<1x8x1xf32>
    %63 = vector.extract_strided_slice %0 {offsets = [0, 9], sizes = [8, 1], strides = [1, 1]} : vector<8x18xf32> to vector<8x1xf32>
    %64 = vector.shape_cast %63 : vector<8x1xf32> to vector<1x8x1xf32>
    %65 = vector.extract_strided_slice %60 {offsets = [0, 0, 0], sizes = [2, 1, 128], strides = [1, 1, 1]} : vector<2x8x128xf32> to vector<2x1x128xf32>
    %66 = vector.broadcast %64 : vector<1x8x1xf32> to vector<2x8x128xf32>
    %67 = vector.broadcast %65 : vector<2x1x128xf32> to vector<2x8x128xf32>
    %68 = arith.mulf %66, %67 : vector<2x8x128xf32>
    %69 = vector.broadcast %62 : vector<1x8x1xf32> to vector<2x8x128xf32>
    %70 = arith.addf %69, %68 : vector<2x8x128xf32>
    %71 = vector.extract_strided_slice %0 {offsets = [0, 10], sizes = [8, 1], strides = [1, 1]} : vector<8x18xf32> to vector<8x1xf32>
    %72 = vector.shape_cast %71 : vector<8x1xf32> to vector<1x8x1xf32>
    %73 = vector.extract_strided_slice %60 {offsets = [0, 1, 0], sizes = [2, 1, 128], strides = [1, 1, 1]} : vector<2x8x128xf32> to vector<2x1x128xf32>
    %74 = vector.broadcast %72 : vector<1x8x1xf32> to vector<2x8x128xf32>
    %75 = vector.broadcast %73 : vector<2x1x128xf32> to vector<2x8x128xf32>
    %76 = arith.mulf %74, %75 : vector<2x8x128xf32>
    %77 = arith.addf %70, %76 : vector<2x8x128xf32>
    %78 = vector.extract_strided_slice %0 {offsets = [0, 11], sizes = [8, 1], strides = [1, 1]} : vector<8x18xf32> to vector<8x1xf32>
    %79 = vector.shape_cast %78 : vector<8x1xf32> to vector<1x8x1xf32>
    %80 = vector.extract_strided_slice %60 {offsets = [0, 2, 0], sizes = [2, 1, 128], strides = [1, 1, 1]} : vector<2x8x128xf32> to vector<2x1x128xf32>
    %81 = vector.broadcast %79 : vector<1x8x1xf32> to vector<2x8x128xf32>
    %82 = vector.broadcast %80 : vector<2x1x128xf32> to vector<2x8x128xf32>
    %83 = arith.mulf %81, %82 : vector<2x8x128xf32>
    %84 = arith.addf %77, %83 : vector<2x8x128xf32>
    %85 = vector.extract_strided_slice %0 {offsets = [0, 12], sizes = [8, 1], strides = [1, 1]} : vector<8x18xf32> to vector<8x1xf32>
    %86 = vector.shape_cast %85 : vector<8x1xf32> to vector<1x8x1xf32>
    %87 = vector.extract_strided_slice %60 {offsets = [0, 3, 0], sizes = [2, 1, 128], strides = [1, 1, 1]} : vector<2x8x128xf32> to vector<2x1x128xf32>
    %88 = vector.broadcast %86 : vector<1x8x1xf32> to vector<2x8x128xf32>
    %89 = vector.broadcast %87 : vector<2x1x128xf32> to vector<2x8x128xf32>
    %90 = arith.mulf %88, %89 : vector<2x8x128xf32>
    %91 = arith.addf %84, %90 : vector<2x8x128xf32>
    %92 = vector.extract_strided_slice %0 {offsets = [0, 13], sizes = [8, 1], strides = [1, 1]} : vector<8x18xf32> to vector<8x1xf32>
    %93 = vector.shape_cast %92 : vector<8x1xf32> to vector<1x8x1xf32>
    %94 = vector.extract_strided_slice %60 {offsets = [0, 4, 0], sizes = [2, 1, 128], strides = [1, 1, 1]} : vector<2x8x128xf32> to vector<2x1x128xf32>
    %95 = vector.broadcast %93 : vector<1x8x1xf32> to vector<2x8x128xf32>
    %96 = vector.broadcast %94 : vector<2x1x128xf32> to vector<2x8x128xf32>
    %97 = arith.mulf %95, %96 : vector<2x8x128xf32>
    %98 = arith.addf %91, %97 : vector<2x8x128xf32>
    %99 = vector.extract_strided_slice %0 {offsets = [0, 14], sizes = [8, 1], strides = [1, 1]} : vector<8x18xf32> to vector<8x1xf32>
    %100 = vector.shape_cast %99 : vector<8x1xf32> to vector<1x8x1xf32>
    %101 = vector.extract_strided_slice %60 {offsets = [0, 5, 0], sizes = [2, 1, 128], strides = [1, 1, 1]} : vector<2x8x128xf32> to vector<2x1x128xf32>
    %102 = vector.broadcast %100 : vector<1x8x1xf32> to vector<2x8x128xf32>
    %103 = vector.broadcast %101 : vector<2x1x128xf32> to vector<2x8x128xf32>
    %104 = arith.mulf %102, %103 : vector<2x8x128xf32>
    %105 = arith.addf %98, %104 : vector<2x8x128xf32>
    %106 = vector.extract_strided_slice %0 {offsets = [0, 15], sizes = [8, 1], strides = [1, 1]} : vector<8x18xf32> to vector<8x1xf32>
    %107 = vector.shape_cast %106 : vector<8x1xf32> to vector<1x8x1xf32>
    %108 = vector.extract_strided_slice %60 {offsets = [0, 6, 0], sizes = [2, 1, 128], strides = [1, 1, 1]} : vector<2x8x128xf32> to vector<2x1x128xf32>
    %109 = vector.broadcast %107 : vector<1x8x1xf32> to vector<2x8x128xf32>
    %110 = vector.broadcast %108 : vector<2x1x128xf32> to vector<2x8x128xf32>
    %111 = arith.mulf %109, %110 : vector<2x8x128xf32>
    %112 = arith.addf %105, %111 : vector<2x8x128xf32>
    %113 = vector.extract_strided_slice %0 {offsets = [0, 16], sizes = [8, 1], strides = [1, 1]} : vector<8x18xf32> to vector<8x1xf32>
    %114 = vector.shape_cast %113 : vector<8x1xf32> to vector<1x8x1xf32>
    %115 = vector.extract_strided_slice %60 {offsets = [0, 7, 0], sizes = [2, 1, 128], strides = [1, 1, 1]} : vector<2x8x128xf32> to vector<2x1x128xf32>
    %116 = vector.broadcast %114 : vector<1x8x1xf32> to vector<2x8x128xf32>
    %117 = vector.broadcast %115 : vector<2x1x128xf32> to vector<2x8x128xf32>
    %118 = arith.mulf %116, %117 : vector<2x8x128xf32>
    %119 = arith.addf %112, %118 : vector<2x8x128xf32>
    %cst_7 = arith.constant 0.000000e+00 : f32
    %120 = vector.broadcast %cst_7 : f32 to vector<2x8x128xf32>
    %121 = arith.maximumf %119, %120 : vector<2x8x128xf32>
    %c0_8 = arith.constant 0 : index
    %c0_9 = arith.constant 0 : index
    %c0_10 = arith.constant 0 : index
    %122 = vector.load %arg3[%c0_8, %c0_9, %c0_10] : memref<2x8x128xf32, #tpu.memory_space<vmem>>, vector<2x8x128xf32>
    tpu.vector_store %arg3[%c0_8, %c0_9, %c0_10], %121 {strides = array<i32>} : memref<2x8x128xf32, #tpu.memory_space<vmem>>, vector<2x8x128xf32>,
    return
  }
  func.func @transform_0(%arg0: i32) -> (i32, i32, i32) {
    %c0_i32 = arith.constant 0 : i32
    %c0_i32_0 = arith.constant 0 : i32
    %c0_i32_1 = arith.constant 0 : i32
    return %arg0, %c0_i32, %c0_i32_0 : i32, i32, i32
  }
  func.func @transform_1(%arg0: i32) -> (i32, i32) {
    %c0_i32 = arith.constant 0 : i32
    %c0_i32_0 = arith.constant 0 : i32
    %c0_i32_1 = arith.constant 0 : i32
    return %c0_i32, %c0_i32_0 : i32, i32
  }
  func.func @transform_2(%arg0: i32) -> (i32, i32, i32) {
    %c0_i32 = arith.constant 0 : i32
    %c0_i32_0 = arith.constant 0 : i32
    %c0_i32_1 = arith.constant 0 : i32
    return %arg0, %c0_i32, %c0_i32_0 : i32, i32, i32
  }
}

</mosaic_0001>

<bundles_post_ra>
// kernel: tpu_custom_call.1
= control target key start
LH: loop header
LB: loop body
LE: loop exit
PB: predicated region body
PF: predicated region fallthrough
CT: control target
= control target key end

     0   :  { %7 = vsyncpa [#allocation3], 0  ;;  %s596_s0 = inlined_call_operand.hbm [shape: f32[2,4,16], index: 0, kind: input, shape index: {}]   ;;  %s597_s1 = inlined_call_operand.hbm [shape: f32[8,18], index: 1, kind: input, shape index: {}]   ;;  %s598_s2 = inlined_call_operand.hbm [shape: f32[2,8,128], index: 2, kind: output, shape index: {}]  }
   0x1   :  { %8 = vsyncpa [#allocation6], 0 }
   0x2   :  { %9 = vsyncpa [#allocation4], 0  ;;  %s458_s9 = smov [#allocation2]   ;;  %s386_s13 = scalar_lea.hbm %s596_s0, 128 }
   0x3   :  { %s15_s10 = sshll.u32 %s458_s9, 4  ;;  %p387_p0 = scmp.ne.s32.totalorder %s596_s0, %s386_s13  ;;  %s16_s10 = int_to_ptr.vmem [resolvable:$true] %s15_s10 }
   0x4   :  { %p390_p1 = scmp.lt.u32.totalorder %s386_s13, %s596_s0 }
   0x6   :  { %p392_p2 = pnand %p390_p1, %p387_p0 }
   0x8   :  { %395 = shalt.err (!%p392_p2)
}
   0x9   :  { %s396_s18 = scalar_lea.vmem %s16_s10, 128  ;;  %p401_p4 = scmp.lt.s32.totalorder %s16_s10, %s16_s10 }
   0xa   :  { %p397_p3 = scmp.ne.s32.totalorder %s16_s10, %s396_s18  ;;  %p402_p5 = scmp.lt.s32.totalorder %s396_s18, %s396_s18 }
   0xc   :  { %p403_p6 = por %p402_p5, %p401_p4 }
   0xe   :  { %p404_p7 = pnand %p403_p6, %p397_p3 }
  0x10   :  { %407 = shalt.err (!%p404_p7)
}
  0x11   :  { %s459_s19 = smov 64   ;;  %s460_s20 = smov 4  }
  0x12   :  { %21 = dma.hbm_to_vmem [thread:$0]  %s596_s0, 128, %s16_s10, [#allocation3], %s459_s19, %s459_s19, %s460_s20  }
  0x13   :  { %s461_s23 = smov [#allocation5]   ;;  %s408_s27 = scalar_lea.hbm %s597_s1, 128 }
  0x14   :  { %s28_s24 = sshll.u32 %s461_s23, 4  ;;  %p409_p8 = scmp.ne.s32.totalorder %s597_s1, %s408_s27  ;;  %s29_s24 = int_to_ptr.vmem [resolvable:$true] %s28_s24 }
  0x15   :  { %p412_p9 = scmp.lt.u32.totalorder %s408_s27, %s597_s1 }
  0x17   :  { %p414_p10 = pnand %p412_p9, %p409_p8 }
  0x19   :  { %417 = shalt.err (!%p414_p10)
}
  0x1a   :  { %s418_s4 = scalar_lea.vmem %s29_s24, 128  ;;  %p423_p12 = scmp.lt.s32.totalorder %s29_s24, %s29_s24 }
  0x1b   :  { %p419_p11 = scmp.ne.s32.totalorder %s29_s24, %s418_s4  ;;  %p424_p13 = scmp.lt.s32.totalorder %s418_s4, %s418_s4 }
  0x1d   :  { %p425_p0 = por %p424_p13, %p423_p12 }
  0x1f   :  { %p426_p1 = pnand %p425_p0, %p419_p11 }
  0x21   :  { %429 = shalt.err (!%p426_p1)
}
  0x22   :  { %31 = dma.hbm_to_vmem [thread:$0]  %s597_s1, 128, %s29_s24, [#allocation6]  }
  0x23   :  { %452 = dma.done.wait [#allocation3], 128  }
  0x24   :  { %453 = vsyncadd [#allocation3], 4294967168 }
  0x25   :  { %454 = dma.done.wait [#allocation6], 128  }
  0x26   :  { %455 = vsyncadd [#allocation6], 4294967168  ;;  %v462_v0 = vmov 1   ;;  %v463_v1 = vmov 0   ;;  %v525_v2 = vld [vmem:[#allocation5] sm:$0xff]  ;;  %v464_v3 = vmov 2   ;;  %v46_v10 = vlaneseq }
  0x27   :  { %369 = vset.pattern.permute.xlu1 %v462_v0  ;;  %367 = vset.pattern.permute.xlu0 %v463_v1  ;;  %v465_v4 = vmov 4   ;;  %v466_v5 = vmov 3   ;;  %v467_v6 = vmov 6   ;;  %v468_v7 = vmov 7   ;;  %v39_v13 = vld [vmem:[#allocation2] sm:$0xf] }
  0x28   :  { %63 = vperm.xlu1 %369, %v525_v2   ;;  %43 = vperm.xlu0 %367, %v525_v2   ;;  %v469_v8 = vmov 5   ;;  %v470_v9 = vmov 8   ;;  %v534_v11 = vshrl.u32 %v46_v10, 7  ;;  %v40_v14 = vld [vmem:[#allocation2 + $0x4] sm:$0xf]  ;;  %s471_s1 = smov 127  }
  0x29   :  { %s472_s6 = smov 126   ;;  %v473_v53 = vmov 17   ;;  %v474_v54 = vmov 9   ;;  %v475_v55 = vmov 10   ;;  %v476_v56 = vmov 11   ;;  %s482_s7 = smov [#allocation7]  }
  0x2a   :  { %v537_v12 = vsub.s32 0, %v534_v11  ;;  %v540_v15 = vsub.s32 1, %v534_v11  ;;  %v545_v20 = vsub.s32 2, %v534_v11  ;;  %v550_v23 = vsub.s32 3, %v534_v11  ;;  %s327_s8 = sshll.u32 %s482_s7, 4  ;;  %s328_s8 = int_to_ptr.vmem [resolvable:$true] %s327_s8 }
  0x2b   :  { %v477_v57 = vmov 12   ;;  %vm120_vm0 = vcmask 31744   ;;  %vm123_vm1 = vcmask 162816   ;;  %vm154_vm2 = vcmask 1039360   ;;  %s430_s9 = scalar_lea.vmem %s328_s8, 256  ;;  %p435_p3 = scmp.lt.s32.totalorder %s328_s8, %s328_s8 }
  0x2c   :  { %370 = vset.pattern.permute.xlu1 %v464_v3  ;;  %368 = vset.pattern.permute.xlu0 %v465_v4  ;;  %v49_v17 = vrot.slane %v39_v13, %v537_v12  ;;  %v53_v18 = vrot.slane %v40_v14, %v537_v12  ;;  %v69_v21 = vrot.slane %v39_v13, %v540_v15  ;;  %vm177_vm3 = vcmask 1031168   ;;  %p431_p2 = scmp.ne.s32.totalorder %s328_s8, %s430_s9  ;;  %p436_p4 = scmp.lt.s32.totalorder %s430_s9, %s430_s9 }
  0x2d   :  { %79 = vperm.xlu1 %370, %v525_v2   ;;  %57 = vperm.xlu0 %368, %v525_v2   ;;  %v73_v22 = vrot.slane %v40_v14, %v540_v15  ;;  %v85_v26 = vrot.slane %v39_v13, %v545_v20  ;;  %v89_v27 = vrot.slane %v40_v14, %v545_v20 }
  0x2e   :  { %v101_v34 = vrot.slane %v39_v13, %v550_v23  ;;  %v105_v35 = vrot.slane %v40_v14, %v550_v23  ;;  %p437_p5 = por %p436_p4, %p435_p3 }
  0x30   :  { %p438_p6 = pnand %p437_p5, %p431_p2 }
  0x31   :  { %371 = vset.pattern.permute.xlu1 %v466_v5  ;;  %372 = vset.pattern.permute.xlu0 %v467_v6  ;;  %v478_v5 = vmov 14   ;;  %v479_v6 = vmov 16  }
  0x32   :  { %95 = vperm.xlu1 %371, %v525_v2   ;;  %139 = vperm.xlu0 %372, %v525_v2  }
  0x36   :  { %373 = vset.pattern.permute.xlu1 %v468_v7  ;;  %375 = vset.pattern.permute.xlu0 %v470_v9  ;;  %v480_v7 = vmov 13  }
  0x37   :  { %162 = vperm.xlu1 %373, %v525_v2  }
  0x3b   :  { %374 = vset.pattern.permute.xlu1 %v469_v8  ;;  %v481_v8 = vmov 15  }
  0xa7   :  { %v64_v16 = vpop.permute.xlu1 %63  ;;  %v44_v19 = vpop.permute.xlu0 %43 }
  0xa8   :  { %v54_v24 = vmul.f32 %v49_v17, %v44_v19  ;;  %v55_v25 = vmul.f32 %v53_v18, %v44_v19  ;;  %v74_v30 = vmul.f32 %v69_v21, %v64_v16  ;;  %v75_v31 = vmul.f32 %v73_v22, %v64_v16 }
  0xac   :  { %v80_v28 = vpop.permute.xlu1 %79  ;;  %v58_v29 = vpop.permute.xlu0 %57 }
  0xad   :  { %v60_v32 = vadd.f32 %v58_v29, %v54_v24  ;;  %v61_v33 = vadd.f32 %v58_v29, %v55_v25  ;;  %v90_v36 = vmul.f32 %v85_v26, %v80_v28  ;;  %v91_v37 = vmul.f32 %v89_v27, %v80_v28 }
  0xaf   :  { %v76_v38 = vadd.f32 %v74_v30, %v60_v32  ;;  %v77_v39 = vadd.f32 %v75_v31, %v61_v33 }
  0xb1   :  { %v96_v40 = vpop.permute.xlu1 %95  ;;  %v93_v41 = vadd.f32 %v91_v37, %v77_v39  ;;  %v92_v42 = vadd.f32 %v90_v36, %v76_v38  ;;  %v140_v49 = vpop.permute.xlu0 %139 }
  0xb2   :  { %v106_v43 = vmul.f32 %v101_v34, %v96_v40  ;;  %v107_v44 = vmul.f32 %v105_v35, %v96_v40  ;;  %v143_v51 = vmul.f32 0.0, %v140_v49 }
  0xb4   :  { %v109_v45 = vadd.f32 %v107_v44, %v93_v41  ;;  %v108_v46 = vadd.f32 %v106_v43, %v92_v42 }
  0xb6   :  { %v111_v47 = vmax.f32 %v109_v45, 0.0  ;;  %v110_v48 = vmax.f32 %v108_v46, 0.0  ;;  %v163_v50 = vpop.permute.xlu1 %162 }
  0xb7   :  { %v166_v52 = vmul.f32 0.0, %v163_v50 }
  0xb8   :  { %116 = vrot.lane.b32.xlu0 %v111_v47, %s460_s20  ;;  %114 = vrot.lane.b32.xlu1 %v110_v48, %s460_s20 }
  0xbc   :  { %127 = vperm.xlu1 %374, %v525_v2   ;;  %133 = vperm.xlu0 %375, %v525_v2  }
  0xc0   :  { %150 = vrot.lane.b32.xlu1 %v143_v51, %s471_s1  ;;  %173 = vrot.lane.b32.xlu0 %v166_v52, %s472_s6  ;;  %v260_v51 = vsub.s32 4, %v534_v11 }
  0xc1   :  { %377 = vset.pattern.permute.xlu1 %v473_v53  ;;  %376 = vset.pattern.permute.xlu0 %v474_v54 }
  0xc4   :  { %201 = vperm.xlu1 %377, %v525_v2   ;;  %187 = vperm.xlu0 %376, %v525_v2  }
  0xc8   :  { %378 = vset.pattern.permute.xlu1 %v475_v55  ;;  %379 = vset.pattern.permute.xlu0 %v476_v56 }
  0xc9   :  { %207 = vperm.xlu1 %378, %v525_v2  }
  0xcd   :  { %380 = vset.pattern.permute.xlu1 %v477_v57 }
 0x12a   :  { %v115_v58 = vpop.permute.xlu1 %114  ;;  %v117_v59 = vpop.permute.xlu0 %116 }
 0x12b   :  { %v121_v60 = vsel %vm120_vm0, 0.0, %v115_v58  ;;  %v122_v61 = vsel %vm120_vm0, 0.0, %v117_v59  ;;  %v276_v59 = vsub.s32 5, %v534_v11 }
 0x12c   :  { %v124_v62 = vsel %vm123_vm1, %v121_v60, 0.0  ;;  %v125_v63 = vsel %vm123_vm1, %v122_v61, 0.0 }
 0x12d   :  { %v142_v0 = vmul.f32 %v140_v49, %v124_v62  ;;  %v144_v1 = vmul.f32 %v140_v49, %v125_v63  ;;  %v165_v3 = vmul.f32 %v163_v50, %v124_v62  ;;  %v167_v4 = vmul.f32 %v163_v50, %v125_v63 }
 0x12f   :  { %148 = vrot.lane.b32.xlu1 %v142_v0, %s471_s1  ;;  %152 = vrot.lane.b32.xlu0 %v144_v1, %s471_s1  ;;  %v292_v1 = vsub.s32 6, %v534_v11 }
 0x133   :  { %171 = vrot.lane.b32.xlu1 %v165_v3, %s472_s6  ;;  %223 = vperm.xlu0 %379, %v525_v2  }
 0x137   :  { %175 = vrot.lane.b32.xlu1 %v167_v4, %s472_s6  ;;  %382 = vset.pattern.permute.xlu0 %v478_v5 }
 0x138   :  { %271 = vperm.xlu0 %382, %v525_v2  }
 0x13b   :  { %239 = vperm.xlu1 %380, %v525_v2   ;;  %v128_v9 = vpop.permute.xlu1 %127  ;;  %v134_v13 = vpop.permute.xlu0 %133 }
 0x13c   :  { %385 = vset.pattern.permute.xlu0 %v479_v6  ;;  %v130_v19 = vmul.f32 %v128_v9, %v124_v62  ;;  %v131_v22 = vmul.f32 %v128_v9, %v125_v63 }
 0x13e   :  { %v136_v26 = vadd.f32 %v134_v13, %v130_v19 }
 0x13f   :  { %381 = vset.pattern.permute.xlu1 %v480_v7  ;;  %v151_v10 = vpop.permute.xlu1 %150  ;;  %v174_v16 = vpop.permute.xlu0 %173 }
 0x140   :  { %255 = vperm.xlu1 %381, %v525_v2  }
 0x143   :  { %v202_v14 = vpop.permute.xlu1 %201  ;;  %v188_v18 = vpop.permute.xlu0 %187 }
 0x144   :  { %383 = vset.pattern.permute.xlu1 %v481_v8 }
 0x145   :  { %287 = vperm.xlu1 %383, %v525_v2  }
 0x148   :  { %v208_v17 = vpop.permute.xlu1 %207 }
 0x149   :  { %384 = vset.pattern.permute.xlu1 %v479_v6 }
 0x14a   :  { %303 = vperm.xlu1 %384, %v525_v2   ;;  %v137_v2 = vadd.f32 %v134_v13, %v131_v22 }
 0x1a1   :  { %v149_v21 = vpop.permute.xlu1 %148  ;;  %v153_v25 = vpop.permute.xlu0 %152 }
 0x1a2   :  { %v155_v24 = vsel %vm154_vm2, %v149_v21, %v151_v10  ;;  %v156_v29 = vsel %vm154_vm2, %v153_v25, %v151_v10  ;;  %v308_v10 = vsub.s32 7, %v534_v11 }
 0x1a3   :  { %v159_v28 = vadd.f32 %v155_v24, %v136_v26  ;;  %v160_v32 = vadd.f32 %v156_v29, %v137_v2 }
 0x1a5   :  { %v172_v27 = vpop.permute.xlu1 %171 }
 0x1a6   :  { %v178_v30 = vsel %vm177_vm3, %v172_v27, %v174_v16 }
 0x1a7   :  { %v182_v31 = vadd.f32 %v178_v30, %v159_v28 }
 0x1a9   :  { %v176_v33 = vpop.permute.xlu1 %175  ;;  %v184_v36 = vmax.f32 %v182_v31, 0.0 }
 0x1aa   :  { %v179_v34 = vsel %vm177_vm3, %v176_v33, %v174_v16 }
 0x1ab   :  { %v183_v35 = vadd.f32 %v179_v34, %v160_v32  ;;  %v193_v39 = vrot.slane %v184_v36, %v537_v12  ;;  %v213_v43 = vrot.slane %v184_v36, %v540_v15  ;;  %v229_v48 = vrot.slane %v184_v36, %v545_v20 }
 0x1ac   :  { %v245_v50 = vrot.slane %v184_v36, %v550_v23  ;;  %v261_v62 = vrot.slane %v184_v36, %v260_v51  ;;  %v277_v7 = vrot.slane %v184_v36, %v276_v59  ;;  %v309_v25 = vrot.slane %v184_v36, %v308_v10 }
 0x1ad   :  { %v185_v37 = vmax.f32 %v183_v35, 0.0  ;;  %v198_v41 = vmul.f32 %v193_v39, %v188_v18  ;;  %v218_v49 = vmul.f32 %v213_v43, %v208_v17 }
 0x1af   :  { %v197_v38 = vrot.slane %v185_v37, %v537_v12  ;;  %v217_v42 = vrot.slane %v185_v37, %v540_v15  ;;  %v204_v46 = vadd.f32 %v202_v14, %v198_v41  ;;  %v233_v12 = vrot.slane %v185_v37, %v545_v20 }
 0x1b0   :  { %v249_v55 = vrot.slane %v185_v37, %v550_v23  ;;  %v265_v63 = vrot.slane %v185_v37, %v260_v51  ;;  %v281_v23 = vrot.slane %v185_v37, %v276_v59  ;;  %v313_v26 = vrot.slane %v185_v37, %v308_v10 }
 0x1b1   :  { %v199_v40 = vmul.f32 %v197_v38, %v188_v18  ;;  %v219_v47 = vmul.f32 %v217_v42, %v208_v17  ;;  %v220_v56 = vadd.f32 %v218_v49, %v204_v46  ;;  %v293_v17 = vrot.slane %v184_v36, %v292_v1 }
 0x1b2   :  { %v224_v45 = vpop.permute.xlu0 %223  ;;  %v297_v18 = vrot.slane %v185_v37, %v292_v1 }
 0x1b3   :  { %v205_v44 = vadd.f32 %v202_v14, %v199_v40  ;;  %v234_v53 = vmul.f32 %v229_v48, %v224_v45  ;;  %v235_v15 = vmul.f32 %v233_v12, %v224_v45 }
 0x1b5   :  { %v221_v52 = vadd.f32 %v219_v47, %v205_v44  ;;  %v236_v60 = vadd.f32 %v234_v53, %v220_v56 }
 0x1b7   :  { %v237_v61 = vadd.f32 %v235_v15, %v221_v52  ;;  %v272_v6 = vpop.permute.xlu0 %271 }
 0x1b8   :  { %v282_v13 = vmul.f32 %v277_v7, %v272_v6  ;;  %v283_v14 = vmul.f32 %v281_v23, %v272_v6 }
 0x1ba   :  { %v240_v54 = vpop.permute.xlu1 %239 }
 0x1bb   :  { %v250_v57 = vmul.f32 %v245_v50, %v240_v54  ;;  %v251_v58 = vmul.f32 %v249_v55, %v240_v54 }
 0x1bd   :  { %v252_v3 = vadd.f32 %v250_v57, %v236_v60  ;;  %v253_v4 = vadd.f32 %v251_v58, %v237_v61 }
 0x1bf   :  { %v256_v0 = vpop.permute.xlu1 %255 }
 0x1c0   :  { %v266_v20 = vmul.f32 %v261_v62, %v256_v0  ;;  %v267_v5 = vmul.f32 %v265_v63, %v256_v0 }
 0x1c2   :  { %v268_v8 = vadd.f32 %v266_v20, %v252_v3  ;;  %v269_v9 = vadd.f32 %v267_v5, %v253_v4 }
 0x1c4   :  { %v288_v16 = vpop.permute.xlu1 %287  ;;  %v284_v19 = vadd.f32 %v282_v13, %v268_v8  ;;  %v285_v21 = vadd.f32 %v283_v14, %v269_v9 }
 0x1c5   :  { %v298_v22 = vmul.f32 %v293_v17, %v288_v16  ;;  %v299_v24 = vmul.f32 %v297_v18, %v288_v16 }
 0x1c7   :  { %v300_v28 = vadd.f32 %v298_v22, %v284_v19  ;;  %v301_v29 = vadd.f32 %v299_v24, %v285_v21 }
 0x1c9   :  { %v304_v27 = vpop.permute.xlu1 %303 }
 0x1ca   :  { %v314_v30 = vmul.f32 %v309_v25, %v304_v27  ;;  %v315_v2 = vmul.f32 %v313_v26, %v304_v27 }
 0x1cc   :  { %v316_v31 = vadd.f32 %v314_v30, %v300_v28  ;;  %v317_v11 = vadd.f32 %v315_v2, %v301_v29 }
 0x1ce   :  { %v318_v32 = vmax.f32 %v316_v31, 0.0  ;;  %v319_v33 = vmax.f32 %v317_v11, 0.0 }
 0x1d0   :  { %320 = vst [vmem:[#allocation7] sm:$0xff] %v318_v32  ;;  %321 = vst [vmem:[#allocation7 + $0x8] sm:$0xff] %v319_v33 }
 0x1d1   :  { %441 = shalt.err (!%p438_p6)
}
 0x1d2   :  { %s442_s12 = scalar_lea.hbm %s598_s2, 256 }
 0x1d3   :  { %p443_p7 = scmp.ne.s32.totalorder %s598_s2, %s442_s12  ;;  %p446_p8 = scmp.lt.u32.totalorder %s442_s12, %s598_s2 }
 0x1d5   :  { %p448_p9 = pnand %p446_p8, %p443_p7 }
 0x1d7   :  { %451 = shalt.err (!%p448_p9)
}
 0x1d8   :  { %s483_s17 = smov 128   ;;  %s484_s18 = smov 8  }
 0x1d9   :  { %333 = dma.vmem_to_hbm [thread:$0]  %s328_s8, 256, %s598_s2, [#allocation4], %s483_s17, %s483_s17, %s484_s18  }
 0x1da   :  { %456 = dma.done.wait [#allocation4], 256  }
 0x1db   :  { %457 = vsyncadd [#allocation4], 4294967040 }
 0x1dc   :  { %337 = vsyncpa [#allocation3], 1 }
 0x1dd   :  { %338 = vsyncpa [#allocation6], 1 }
 0x1de   :  { %339 = vsyncpa [#allocation4], 1 }

</bundles_post_ra>
